<compile_context>
chip_gen: v6e
topology: v6e:2x2x1
jax: 0.10.0
libtpu: 0.0.40
codegen_flags: <defaults>
</compile_context>

<pallas_src>
import functools

import jax
import jax.numpy as jnp
from jax.experimental import pallas as pl
from jax.experimental.pallas import tpu as pltpu


def _fused_mlp_kernel(*refs, num_layers, negative_slope):
    """Fused MLP: h <- leaky_relu(h @ W_l + b_l) for l in [0, num_layers).

    refs = (x_ref, w_0, b_0, w_1, b_1, ..., w_{L-1}, b_{L-1}, o_ref)

    All arrays carry their REAL (unpadded) layer shapes; the intermediate
    activations never leave vregs/VMEM, so HBM traffic is just the narrow
    (tile_b, latent_dim) input and (tile_b, out_dim) output streams.
    """
    x_ref = refs[0]
    o_ref = refs[-1]
    h = x_ref[...].astype(jnp.float32)
    for l in range(num_layers):                      # unrolled at trace time
        w = refs[1 + 2 * l][...]                     # (K_l, N_l)
        b = refs[2 + 2 * l][...]                     # (1,  N_l)
        y = jnp.dot(h, w, preferred_element_type=jnp.float32) + b
        h = jnp.maximum(y, negative_slope * y)       # LeakyReLU (0 < slope < 1)
    o_ref[...] = h.astype(o_ref.dtype)


def init_mlp_core_params(key, latent_dim, layer_size, num_hidden,
                         y_mix_latent_dim=None, dtype=jnp.float32):
    """Deterministic init mirroring nn.Linear shapes.

    Returns a list of (w, b) with w stored as (in_features, out_features) and
    b as (1, out_features).
    """
    latent_dim2 = y_mix_latent_dim if y_mix_latent_dim is not None else latent_dim
    dims = [latent_dim] + [layer_size] * (num_hidden + 1) + [latent_dim2]
    params = []
    for fan_in, fan_out in zip(dims[:-1], dims[1:]):
        key, kw, kb = jax.random.split(key, 3)
        bound = 1.0 / (fan_in ** 0.5)  # same bound PyTorch Linear uses
        w = jax.random.uniform(kw, (fan_in, fan_out), dtype, -bound, bound)
        b = jax.random.uniform(kb, (1, fan_out), dtype, -bound, bound)
        params.append((w, b))
    return params


def mlp_core_forward(latent_input, params, *, negative_slope=0.01, tile_b=2048):
    """Equivalent of MlpCore.forward: activation after every linear layer."""
    B, D = latent_input.shape
    num_layers = len(params)
    out_dim = params[-1][0].shape[1]
    kernel = functools.partial(_fused_mlp_kernel,
                               num_layers=num_layers,
                               negative_slope=negative_slope)

    flat = []
    for w, b in params:
        flat += [w.astype(jnp.float32), b.astype(jnp.float32)]
    x = latent_input.astype(jnp.float32)

    if B <= tile_b:
        # Small batch: one full-block call, no grid / no pipeline setup.
        # Only the batch rows are padded (to a sublane multiple); no lane pad.
        b_pad = ((B + 7) // 8) * 8
        if b_pad != B:
            x = jnp.zeros((b_pad, D), jnp.float32).at[:B].set(x)
        vmem = pl.BlockSpec(memory_space=pltpu.MemorySpace.VMEM)
        out = pl.pallas_call(
            kernel,
            out_shape=jax.ShapeDtypeStruct((b_pad, out_dim), jnp.float32),
            in_specs=[vmem] * (1 + 2 * num_layers),
            out_specs=vmem,
        )(x, *flat)
    else:
        # Large batch: tile the batch axis only.  Input blocks are the real
        # (tile_b, D) width and the output blocks the real (tile_b, out_dim)
        # width -> HBM traffic is just the true bytes.  Weights/biases have
        # constant index_maps so they stay VMEM-resident across tiles.
        # "parallel" lets v7x shard the batch tiles across its two TensorCores.
        b_pad = ((B + tile_b - 1) // tile_b) * tile_b
        if b_pad != B:
            x = jnp.zeros((b_pad, D), jnp.float32).at[:B].set(x)
        in_specs = [pl.BlockSpec((tile_b, D), lambda i: (i, 0))]
        for arr in flat:
            in_specs.append(pl.BlockSpec(arr.shape, lambda i: (0, 0)))
        out = pl.pallas_call(
            kernel,
            out_shape=jax.ShapeDtypeStruct((b_pad, out_dim), jnp.float32),
            grid=(b_pad // tile_b,),
            in_specs=in_specs,
            out_specs=pl.BlockSpec((tile_b, out_dim), lambda i: (i, 0)),
            compiler_params=pltpu.CompilerParams(
                dimension_semantics=("parallel",)),
        )(x, *flat)

    return out[:B]


def _reference_forward(x, params, negative_slope=0.01):
    out = x
    for w, b in params:
        y = out @ w + b
        out = jnp.where(y > 0, y, negative_slope * y)
    return out


if __name__ == "__main__":
    # Small synthetic config matching the PyTorch module.
    batch = 2
    latent_dim = 8
    layer_size = 32
    num_hidden = 2

    key = jax.random.PRNGKey(0)
    key_x, key_x2, key_p = jax.random.split(key, 3)

    x = jax.random.normal(key_x, (batch, latent_dim), jnp.float32)
    params = init_mlp_core_params(key_p, latent_dim, layer_size, num_hidden)

    # 1) Small-batch (no-grid, fully fused) path.
    out = mlp_core_forward(x, params)
    out = jax.block_until_ready(out)
    ref = _reference_forward(x, params)
    assert out.shape == (batch, latent_dim)
    assert jnp.allclose(out, ref, atol=1e-5, rtol=1e-5)

    # 2) Batch-tiled path: 8192 rows / tile_b=2048 -> 4 even grid steps
    #    (keeps both v7x TensorCores busy; same code path on v5e/v6e).
    big_batch = 8192
    x_big = jax.random.normal(key_x2, (big_batch, latent_dim), jnp.float32)
    out_big = mlp_core_forward(x_big, params, tile_b=2048)
    out_big = jax.block_until_ready(out_big)
    ref_big = _reference_forward(x_big, params)
    assert out_big.shape == (big_batch, latent_dim)
    assert jnp.allclose(out_big, ref_big, atol=1e-5, rtol=1e-5)

    print("KERNEL_OK")
</pallas_src>

<mosaic_0001>
module attributes {stable_mosaic.version = 11 : i64} {
  func.func @_fused_mlp_kernel(%arg0: memref<8x8xf32, #tpu.memory_space<vmem>>, %arg1: memref<8x32xf32, #tpu.memory_space<vmem>>, %arg2: memref<1x32xf32, #tpu.memory_space<vmem>>, %arg3: memref<32x32xf32, #tpu.memory_space<vmem>>, %arg4: memref<1x32xf32, #tpu.memory_space<vmem>>, %arg5: memref<32x32xf32, #tpu.memory_space<vmem>>, %arg6: memref<1x32xf32, #tpu.memory_space<vmem>>, %arg7: memref<32x8xf32, #tpu.memory_space<vmem>>, %arg8: memref<1x8xf32, #tpu.memory_space<vmem>>, %arg9: memref<8x8xf32, #tpu.memory_space<vmem>>) attributes {dimension_semantics = [], scalar_prefetch = 0 : i64, scratch_operands = 0 : i64, tpu.core_type = #tpu.core_type<tc>} {
    %c0 = arith.constant 0 : index
    %c0_0 = arith.constant 0 : index
    %0 = vector.load %arg0[%c0, %c0_0] : memref<8x8xf32, #tpu.memory_space<vmem>>, vector<8x8xf32>
    %c0_1 = arith.constant 0 : index
    %c0_2 = arith.constant 0 : index
    %1 = vector.load %arg1[%c0_1, %c0_2] : memref<8x32xf32, #tpu.memory_space<vmem>>, vector<8x32xf32>
    %c0_3 = arith.constant 0 : index
    %c0_4 = arith.constant 0 : index
    %2 = vector.load %arg2[%c0_3, %c0_4] : memref<1x32xf32, #tpu.memory_space<vmem>>, vector<1x32xf32>
    %cst = arith.constant dense<0.000000e+00> : vector<8x32xf32>
    %3 = tpu.matmul %0, %1, %cst {dimension_numbers = #tpu.dot_dimension_numbers<[1], [0], [0], [1], [0, 0, 1, 1], [], []>} : vector<8x8xf32>, vector<8x32xf32>, vector<8x32xf32> -> vector<8x32xf32>
    %4 = vector.broadcast %2 : vector<1x32xf32> to vector<8x32xf32>
    %5 = arith.addf %3, %4 : vector<8x32xf32>
    %cst_5 = arith.constant 0.00999999977 : f32
    %6 = vector.broadcast %cst_5 : f32 to vector<8x32xf32>
    %7 = arith.mulf %6, %5 : vector<8x32xf32>
    %8 = arith.maximumf %5, %7 : vector<8x32xf32>
    %c0_6 = arith.constant 0 : index
    %c0_7 = arith.constant 0 : index
    %9 = vector.load %arg3[%c0_6, %c0_7] : memref<32x32xf32, #tpu.memory_space<vmem>>, vector<32x32xf32>
    %c0_8 = arith.constant 0 : index
    %c0_9 = arith.constant 0 : index
    %10 = vector.load %arg4[%c0_8, %c0_9] : memref<1x32xf32, #tpu.memory_space<vmem>>, vector<1x32xf32>
    %cst_10 = arith.constant dense<0.000000e+00> : vector<8x32xf32>
    %11 = tpu.matmul %8, %9, %cst_10 {dimension_numbers = #tpu.dot_dimension_numbers<[1], [0], [0], [1], [0, 0, 1, 1], [], []>} : vector<8x32xf32>, vector<32x32xf32>, vector<8x32xf32> -> vector<8x32xf32>
    %12 = vector.broadcast %10 : vector<1x32xf32> to vector<8x32xf32>
    %13 = arith.addf %11, %12 : vector<8x32xf32>
    %cst_11 = arith.constant 0.00999999977 : f32
    %14 = vector.broadcast %cst_11 : f32 to vector<8x32xf32>
    %15 = arith.mulf %14, %13 : vector<8x32xf32>
    %16 = arith.maximumf %13, %15 : vector<8x32xf32>
    %c0_12 = arith.constant 0 : index
    %c0_13 = arith.constant 0 : index
    %17 = vector.load %arg5[%c0_12, %c0_13] : memref<32x32xf32, #tpu.memory_space<vmem>>, vector<32x32xf32>
    %c0_14 = arith.constant 0 : index
    %c0_15 = arith.constant 0 : index
    %18 = vector.load %arg6[%c0_14, %c0_15] : memref<1x32xf32, #tpu.memory_space<vmem>>, vector<1x32xf32>
    %cst_16 = arith.constant dense<0.000000e+00> : vector<8x32xf32>
    %19 = tpu.matmul %16, %17, %cst_16 {dimension_numbers = #tpu.dot_dimension_numbers<[1], [0], [0], [1], [0, 0, 1, 1], [], []>} : vector<8x32xf32>, vector<32x32xf32>, vector<8x32xf32> -> vector<8x32xf32>
    %20 = vector.broadcast %18 : vector<1x32xf32> to vector<8x32xf32>
    %21 = arith.addf %19, %20 : vector<8x32xf32>
    %cst_17 = arith.constant 0.00999999977 : f32
    %22 = vector.broadcast %cst_17 : f32 to vector<8x32xf32>
    %23 = arith.mulf %22, %21 : vector<8x32xf32>
    %24 = arith.maximumf %21, %23 : vector<8x32xf32>
    %c0_18 = arith.constant 0 : index
    %c0_19 = arith.constant 0 : index
    %25 = vector.load %arg7[%c0_18, %c0_19] : memref<32x8xf32, #tpu.memory_space<vmem>>, vector<32x8xf32>
    %c0_20 = arith.constant 0 : index
    %c0_21 = arith.constant 0 : index
    %26 = vector.load %arg8[%c0_20, %c0_21] : memref<1x8xf32, #tpu.memory_space<vmem>>, vector<1x8xf32>
    %cst_22 = arith.constant dense<0.000000e+00> : vector<8x8xf32>
    %27 = tpu.matmul %24, %25, %cst_22 {dimension_numbers = #tpu.dot_dimension_numbers<[1], [0], [0], [1], [0, 0, 1, 1], [], []>} : vector<8x32xf32>, vector<32x8xf32>, vector<8x8xf32> -> vector<8x8xf32>
    %28 = vector.broadcast %26 : vector<1x8xf32> to vector<8x8xf32>
    %29 = arith.addf %27, %28 : vector<8x8xf32>
    %cst_23 = arith.constant 0.00999999977 : f32
    %30 = vector.broadcast %cst_23 : f32 to vector<8x8xf32>
    %31 = arith.mulf %30, %29 : vector<8x8xf32>
    %32 = arith.maximumf %29, %31 : vector<8x8xf32>
    %c0_24 = arith.constant 0 : index
    %c0_25 = arith.constant 0 : index
    %33 = vector.load %arg9[%c0_24, %c0_25] : memref<8x8xf32, #tpu.memory_space<vmem>>, vector<8x8xf32>
    tpu.vector_store %arg9[%c0_24, %c0_25], %32 {strides = array<i32>} : memref<8x8xf32, #tpu.memory_space<vmem>>, vector<8x8xf32>,
    return
  }
}

</mosaic_0001>

<bundles_post_ra>
// kernel: tpu_custom_call.1
= control target key start
LH: loop header
LB: loop body
LE: loop exit
PB: predicated region body
PF: predicated region fallthrough
CT: control target
= control target key end

     0   :  { %14 = vsyncpa [#allocation3], 0  ;;  %s670_s0 = inlined_call_operand.vmem [shape: f32[8,8], index: 0, kind: input, shape index: {}]   ;;  %s671_s1 = inlined_call_operand.hbm [shape: f32[8,32], index: 1, kind: input, shape index: {}]   ;;  %s672_s2 = inlined_call_operand.vmem [shape: f32[1,32], index: 2, kind: input, shape index: {}]   ;;  %s673_s3 = inlined_call_operand.vmem [shape: f32[32,32], index: 3, kind: input, shape index: {}]   ;;  %s674_s4 = inlined_call_operand.vmem [shape: f32[1,32], index: 4, kind: input, shape index: {}]   ;;  %s675_s5 = inlined_call_operand.hbm [shape: f32[32,32], index: 5, kind: input, shape index: {}]   ;;  %s676_s6 = inlined_call_operand.vmem [shape: f32[1,32], index: 6, kind: input, shape index: {}]   ;;  %s677_s7 = inlined_call_operand.vmem [shape: f32[32,8], index: 7, kind: input, shape index: {}]   ;;  %s678_s8 = inlined_call_operand.vmem [shape: f32[1,8], index: 8, kind: input, shape index: {}]   ;;  %s679_s9 = inlined_call_operand.hbm [shape: f32[8,8], index: 9, kind: output, shape index: {}]  }
   0x1   :  { %15 = vsyncpa [#allocation6], 0 }
   0x2   :  { %16 = vsyncpa [#allocation4], 0  ;;  %s556_s30 = smov [#allocation2]   ;;  %s557_s11 = smov [#allocation5]  }
   0x3   :  { %s25_s10 = sshll.u32 %s556_s30, 4  ;;  %s40_s12 = sshll.u32 %s557_s11, 4  ;;  %s26_s10 = int_to_ptr.vmem [resolvable:$true] %s25_s10  ;;  %s41_s12 = int_to_ptr.vmem [resolvable:$true] %s40_s12 }
   0x4   :  { %s498_s13 = scalar_lea.vmem %s26_s10, 128  ;;  %p503_p1 = scmp.lt.s32.totalorder %s26_s10, %s26_s10 }
   0x5   :  { %p499_p0 = scmp.ne.s32.totalorder %s26_s10, %s498_s13  ;;  %p504_p2 = scmp.lt.s32.totalorder %s498_s13, %s498_s13 }
   0x7   :  { %p505_p3 = por %p504_p2, %p503_p1 }
   0x9   :  { %p506_p4 = pnand %p505_p3, %p499_p0 }
   0xb   :  { %509 = shalt.err (!%p506_p4)
}
   0xc   :  { %28 = dma.hbm_to_vmem [thread:$0]  %s671_s1, 128, %s26_s10, [#allocation3]  }
   0xd   :  { %s518_s16 = scalar_lea.vmem %s41_s12, 512  ;;  %p523_p6 = scmp.lt.s32.totalorder %s41_s12, %s41_s12 }
   0xe   :  { %p519_p5 = scmp.ne.s32.totalorder %s41_s12, %s518_s16  ;;  %p524_p7 = scmp.lt.s32.totalorder %s518_s16, %s518_s16 }
  0x10   :  { %p525_p8 = por %p524_p7, %p523_p6 }
  0x12   :  { %p526_p9 = pnand %p525_p8, %p519_p5 }
  0x14   :  { %529 = shalt.err (!%p526_p9)
}
  0x15   :  { %s558_s17 = smov 128   ;;  %s559_s18 = smov 8  }
  0x16   :  { %46 = dma.hbm_to_vmem [thread:$0]  %s675_s5, 512, %s41_s12, [#allocation6], %s558_s17, %s558_s17, %s559_s18  }
  0x17   :  { %550 = dma.done.wait [#allocation3], 128  }
  0x18   :  { %551 = vsyncadd [#allocation3], 4294967168 }
  0x19   :  { %552 = dma.done.wait [#allocation6], 512  }
  0x1a   :  { %553 = vsyncadd [#allocation6], 4294966784  ;;  %v560_v0 = vmov 0.0   ;;  %vm561_vm0 = vmmov 0   ;;  %vm68_vm1 = vcmask 64512   ;;  %v60_v1 = vld [vmem:[#allocation2] sm:$0xff] }
  0x1b   :  { %445 = vmatprep.subr.mxu0 %v560_v0  ;;  %447 = vmatprep.mubr.msk.f32.mxu0 %vm561_vm0, %v560_v0  ;;  %v59_v2 = vld [vmem:[%s670_s0] sm:$0xff]  ;;  %v147_v3 = vld [vmem:[%s673_s3 + $0x18] sm:$0xff]  ;;  %v146_v4 = vld [vmem:[%s673_s3 + $0x10] sm:$0xff]  ;;  %vm155_vm2 = vcmask 261120  }
  0x1c   :  { %450 = vmatprep.subr.mxu1 %v560_v0  ;;  %458 = vmatprep.mubr.msk.f32.mxu1 %vm561_vm0, %v560_v0  ;;  %v145_v5 = vld [vmem:[%s673_s3 + $0x8] sm:$0xff]  ;;  %v144_v6 = vld [vmem:[%s673_s3] sm:$0xff]  ;;  %v233_v14 = vld [vmem:[#allocation5 + $0x10] sm:$0xff] }
  0x1d   :  { %446 = vmatpush3.msra.mxu0 %v60_v1  ;;  %451 = vmatpush3.msra.mxu1 %v147_v3  ;;  %v420_v7 = vld [vmem:[%s672_s2] ss:$0 sm:$0xff]  ;;  %v232_v15 = vld [vmem:[#allocation5 + $0x8] sm:$0xff]  ;;  %v231_v16 = vld [vmem:[#allocation5] sm:$0xff] }
  0x1e   :  { %448 = vmatmul.mubr.msk.f32.vlgmr.msra.gmra.mxu0 %vm68_vm1, %v59_v2  ;;  %461 = vmatprep.subr.mxu0 %v560_v0  ;;  %v234_v13 = vld [vmem:[#allocation5 + $0x18] sm:$0xff]  ;;  %v320_v23 = vld [vmem:[%s677_s7 + $0x18] sm:$0xff]  ;;  %v319_v24 = vld [vmem:[%s677_s7 + $0x10] sm:$0xff] }
  0x1f   :  { %469 = vmatprep.mubr.msk.f32.mxu0 %vm561_vm0, %v560_v0  ;;  %452 = vmatprep.subr.mxu1 %v560_v0  ;;  %v422_v17 = vld [vmem:[%s674_s4] ss:$0 sm:$0xff]  ;;  %v318_v25 = vld [vmem:[%s677_s7 + $0x8] sm:$0xff] }
  0x20   :  { %453 = vmatpush3.msra.mxu1 %v146_v4  ;;  %462 = vmatpush3.msra.mxu0 %v234_v13  ;;  %v317_v26 = vld [vmem:[%s677_s7] sm:$0xff]  ;;  %s562_s7 = smov [#allocation7]  }
  0x21   :  { %454 = vmatprep.subr.mxu1 %v560_v0  ;;  %463 = vmatprep.subr.mxu0 %v560_v0  ;;  %v424_v27 = vld [vmem:[%s676_s6] ss:$0 sm:$0xff]  ;;  %s410_s20 = sshll.u32 %s562_s7, 4  ;;  %s411_s20 = int_to_ptr.vmem [resolvable:$true] %s410_s20 }
  0x22   :  { %455 = vmatpush3.msra.mxu1 %v145_v5  ;;  %464 = vmatpush3.msra.mxu0 %v233_v14  ;;  %v426_v33 = vld [vmem:[%s678_s8] ss:$0 sm:$0xff]  ;;  %s530_s6 = scalar_lea.vmem %s411_s20, 128  ;;  %p535_p11 = scmp.lt.s32.totalorder %s411_s20, %s411_s20 }
  0x23   :  { %456 = vmatprep.subr.mxu1 %v560_v0  ;;  %465 = vmatprep.subr.mxu0 %v560_v0  ;;  %p531_p10 = scmp.ne.s32.totalorder %s411_s20, %s530_s6  ;;  %p536_p12 = scmp.lt.s32.totalorder %s530_s6, %s530_s6 }
  0x24   :  { %457 = vmatpush3.msra.mxu1 %v144_v6  ;;  %466 = vmatpush3.msra.mxu0 %v232_v15 }
  0x25   :  { %472 = vmatprep.subr.mxu1 %v560_v0  ;;  %467 = vmatprep.subr.mxu0 %v560_v0  ;;  %p537_p13 = por %p536_p12, %p535_p11 }
  0x26   :  { %468 = vmatpush3.msra.mxu0 %v231_v16 }
  0x27   :  { %p538_p0 = pnand %p537_p13, %p531_p10 }
  0xde   :  { %v138_v8 = vpop.f32.mrf.mxu0 }
  0xdf   :  { %v139_v9 = vadd.f32 %v420_v7, %v138_v8 }
  0xe0   :  { %v449_v10 = vpop.f32.mrf.mxu0 }
  0xe1   :  { %v142_v11 = vmul.f32 0.01, %v139_v9 }
  0xe3   :  { %v143_v12 = vmax.f32 %v139_v9, %v142_v11 }
  0xe5   :  { %459 = vmatmul.mubr.msk.f32.vlgmr.msra.gmra.mxu1 %vm155_vm2, %v143_v12 }
  0xe6   :  { %480 = vmatprep.mubr.msk.f32.mxu1 %vm561_vm0, %v560_v0  ;;  %473 = vmatpush3.msra.mxu1 %v320_v23 }
  0xe7   :  { %474 = vmatprep.subr.mxu1 %v560_v0 }
  0xe8   :  { %475 = vmatpush3.msra.mxu1 %v319_v24 }
  0xe9   :  { %476 = vmatprep.subr.mxu1 %v560_v0 }
  0xea   :  { %477 = vmatpush3.msra.mxu1 %v318_v25 }
  0xeb   :  { %478 = vmatprep.subr.mxu1 %v560_v0 }
  0xec   :  { %479 = vmatpush3.msra.mxu1 %v317_v26 }
 0x1a5   :  { %v225_v18 = vpop.f32.mrf.mxu1 }
 0x1a6   :  { %v226_v19 = vadd.f32 %v422_v17, %v225_v18 }
 0x1a7   :  { %v460_v20 = vpop.f32.mrf.mxu1 }
 0x1a8   :  { %v229_v21 = vmul.f32 0.01, %v226_v19 }
 0x1aa   :  { %v230_v22 = vmax.f32 %v226_v19, %v229_v21 }
 0x1ac   :  { %470 = vmatmul.mubr.msk.f32.vlgmr.msra.gmra.mxu0 %vm155_vm2, %v230_v22 }
 0x26c   :  { %v311_v28 = vpop.f32.mrf.mxu0 }
 0x26d   :  { %v312_v29 = vadd.f32 %v424_v27, %v311_v28 }
 0x26e   :  { %v471_v30 = vpop.f32.mrf.mxu0 }
 0x26f   :  { %v315_v31 = vmul.f32 0.01, %v312_v29 }
 0x271   :  { %v316_v32 = vmax.f32 %v312_v29, %v315_v31 }
 0x273   :  { %481 = vmatmul.mubr.msk.f32.vlgmr.msra.gmra.mxu1 %vm155_vm2, %v316_v32 }
 0x333   :  { %v397_v34 = vpop.f32.mrf.mxu1 }
 0x334   :  { %v398_v35 = vadd.f32 %v426_v33, %v397_v34 }
 0x335   :  { %v482_v36 = vpop.f32.mrf.mxu1 }
 0x336   :  { %v401_v37 = vmul.f32 0.01, %v398_v35 }
 0x338   :  { %v402_v38 = vmax.f32 %v398_v35, %v401_v37 }
 0x33a   :  { %403 = vst.msk [vmem:[#allocation7] sm:$0xff] %vm68_vm1, %v402_v38 }
 0x33b   :  { %541 = shalt.err (!%p538_p0)
}
 0x33c   :  { %413 = dma.vmem_to_hbm [thread:$0]  %s411_s20, 128, %s679_s9, [#allocation4]  }
 0x33d   :  { %554 = dma.done.wait [#allocation4], 128  }
 0x33e   :  { %555 = vsyncadd [#allocation4], 4294967168 }
 0x33f   :  { %417 = vsyncpa [#allocation3], 1 }
 0x340   :  { %418 = vsyncpa [#allocation6], 1 }
 0x341   :  { %419 = vsyncpa [#allocation4], 1 }

</bundles_post_ra>
